<compile_context>
chip_gen: v7x
topology: tpu7x:2x2x1
jax: 0.10.0
libtpu: 0.0.40
codegen_flags: <defaults>
</compile_context>

<pallas_src>
import math

import jax
import jax.numpy as jnp
from jax import lax
from jax.experimental import pallas as pl
from jax.experimental.pallas import tpu as pltpu

F32 = jnp.float32
BF16 = jnp.bfloat16
# Conservative scoped-VMEM request: safe on v5e/v6e (128 MiB phys) and on
# v7x (64 MiB phys); our largest per-call footprint is ~7 MiB.
_VMEM_LIMIT = 32 * 1024 * 1024


def _round_up(a, b):
    return -(-a // b) * b


# ------------------------------ kernels ------------------------------------

def _stem_kernel(x_ref, w1_ref, b1_ref, s0_ref, t0_ref, w2_ref, b2_ref, h0_ref):
    # h0 = lin1_2(relu(bn1_1(lin1_1(x))))   (BatchNorm folded to scale/shift, eval)
    h = jnp.dot(x_ref[...].astype(BF16), w1_ref[...],
                preferred_element_type=F32) + b1_ref[...]
    h = jnp.maximum(h * s0_ref[...] + t0_ref[...], 0.0)
    h = jnp.dot(h.astype(BF16), w2_ref[...],
                preferred_element_type=F32) + b2_ref[...]
    h0_ref[...] = h.astype(h0_ref.dtype)          # bf16 store (halves h traffic)


def _gin_update(z, w1_ref, b1_ref, w2_ref, b2_ref, s_ref, t_ref):
    # nn(z) = Linear -> ReLU -> Linear, then folded eval-BN + ReLU.
    z = jnp.dot(z.astype(BF16), w1_ref[...],
                preferred_element_type=F32) + b1_ref[...]
    z = jnp.maximum(z, 0.0)
    z = jnp.dot(z.astype(BF16), w2_ref[...],
                preferred_element_type=F32) + b2_ref[...]
    return jnp.maximum(z * s_ref[...] + t_ref[...], 0.0)


def _conv_kernel(a_ref, hsrc_ref, hdst_ref, w1_ref, b1_ref, w2_ref, b2_ref,
                 s_ref, t_ref, hout_ref, acc_ref):
    # GINConv(aggr='mean', eps=0): nn(h_i + mean_j h_j), then folded BN + ReLU.
    k = pl.program_id(1)

    @pl.when(k == 0)
    def _():
        acc_ref[...] = jnp.zeros_like(acc_ref)

    # mean aggregation: accumulate A[dst_tile, src_tile] @ h[src_tile] over k
    # (A and h are bf16 in HBM; f32 accumulation on the MXU).
    acc_ref[...] += jnp.dot(a_ref[...], hsrc_ref[...], preferred_element_type=F32)

    @pl.when(k == pl.num_programs(1) - 1)
    def _():
        z = hdst_ref[...].astype(F32) + acc_ref[...]   # (1+eps)*h_i + mean_j h_j
        h = _gin_update(z, w1_ref, b1_ref, w2_ref, b2_ref, s_ref, t_ref)
        hout_ref[...] = h.astype(hout_ref.dtype)


def _conv3_kernel(a_ref, hsrc_ref, hdst_ref, h1_ref, w1_ref, b1_ref, w2_ref,
                  b2_ref, s_ref, t_ref, hout_ref, npool_ref, acc_ref):
    # Same as _conv_kernel but also emits the fused node-level readout
    # node_pool = h1 + h2 + h3 (hidden_rep[0] is excluded, as in the reference).
    k = pl.program_id(1)

    @pl.when(k == 0)
    def _():
        acc_ref[...] = jnp.zeros_like(acc_ref)

    acc_ref[...] += jnp.dot(a_ref[...], hsrc_ref[...], preferred_element_type=F32)

    @pl.when(k == pl.num_programs(1) - 1)
    def _():
        h2 = hdst_ref[...].astype(F32)
        z = h2 + acc_ref[...]
        h3 = _gin_update(z, w1_ref, b1_ref, w2_ref, b2_ref, s_ref, t_ref)
        hout_ref[...] = h3.astype(hout_ref.dtype)
        npool_ref[...] = h1_ref[...].astype(F32) + h2 + h3


def _gpool_kernel(pt_ref, h0_ref, h1_ref, h2_ref, h3_ref,
                  wp0_ref, wp1_ref, wp2_ref, wp3_ref, bps_ref,
                  gpool_ref, a0_ref, a1_ref, a2_ref, a3_ref):
    # Graph readout, pooled-first: acc_l += P^T_tile @ h_l_tile  (GP x HP each),
    # then a single tiny Wp application at the end.
    i = pl.program_id(0)

    @pl.when(i == 0)
    def _():
        a0_ref[...] = jnp.zeros_like(a0_ref)
        a1_ref[...] = jnp.zeros_like(a1_ref)
        a2_ref[...] = jnp.zeros_like(a2_ref)
        a3_ref[...] = jnp.zeros_like(a3_ref)

    pt = pt_ref[...].astype(BF16)

    def pool(h_ref):
        return lax.dot_general(
            pt, h_ref[...],
            dimension_numbers=(((0,), (0,)), ((), ())),   # contract node axis
            preferred_element_type=F32)

    a0_ref[...] += pool(h0_ref)
    a1_ref[...] += pool(h1_ref)
    a2_ref[...] += pool(h2_ref)
    a3_ref[...] += pool(h3_ref)

    @pl.when(i == pl.num_programs(0) - 1)
    def _():
        g = jnp.dot(a0_ref[...].astype(BF16), wp0_ref[...],
                    preferred_element_type=F32)
        g = g + jnp.dot(a1_ref[...].astype(BF16), wp1_ref[...],
                        preferred_element_type=F32)
        g = g + jnp.dot(a2_ref[...].astype(BF16), wp2_ref[...],
                        preferred_element_type=F32)
        g = g + jnp.dot(a3_ref[...].astype(BF16), wp3_ref[...],
                        preferred_element_type=F32)
        gpool_ref[...] = g + bps_ref[...]


# ------------------------------ wrapper -------------------------------------

def gin_embedding_forward(x, edge_index, batch, params, num_graphs, row_tile=None):
    N, C = x.shape
    H = params["w_in1"].shape[1]
    G = num_graphs

    # lane/sublane-dense padded sizes
    HP = _round_up(max(H, 128), 128)
    CP = _round_up(max(C, 8), 8)
    GP = _round_up(max(G, 8), 8)

    # dst-row tile (default 1024: amortizes the ~0.35us per-grid-step overhead
    # and cuts re-read traffic of the src hidden state linearly).
    if row_tile:
        TM = _round_up(row_tile, 8)
    else:
        TM = min(1024, _round_up(N, 8))
    # pad node dim to a multiple of both TM and 128 so TK stays lane-aligned
    NP = _round_up(N, (TM * 128) // math.gcd(TM, 128))
    nt = NP // TM

    # src (contraction) tile: multiple of 128, <=1024, and TM*TK <= 4M elems
    # (bf16 A tile <= 8 MiB per pipeline buffer -> fits v7x's 64 MiB VMEM).
    tk_cap = min(NP, 1024, max(128, ((4 * 1024 * 1024) // TM) // 128 * 128))
    TK = 128
    for cand in range(tk_cap, 127, -128):
        if NP % cand == 0:
            TK = cand
            break
    nk = NP // TK

    # Row-normalized adjacency for mean aggregation over in-neighbors (glue),
    # stored bf16 — it is the dominant HBM stream of the conv layers.
    src, dst = edge_index[0], edge_index[1]
    A = jnp.zeros((NP, NP), F32).at[dst, src].add(1.0)
    deg = A.sum(axis=1, keepdims=True)
    A = jnp.where(deg > 0, A / jnp.maximum(deg, 1.0), 0.0).astype(BF16)

    # Node-major mean-pool matrix P^T [NP, GP] (lane dim = graphs; full extent).
    onehot = (batch[:, None] == jnp.arange(GP)[None, :]).astype(F32)
    onehot = jnp.pad(onehot, ((0, NP - N), (0, 0)))
    PT = onehot / jnp.maximum(onehot.sum(axis=0, keepdims=True), 1.0)

    # Zero-pad params to the lane-dense layout; matmul weights -> bf16,
    # bias / BN scale-shift stay f32 (f32 VPU epilogue, incl. v5e).
    def pad(a, r, c):
        return jnp.pad(a, ((0, r - a.shape[0]), (0, c - a.shape[1])))

    w_in1 = pad(params["w_in1"], CP, HP).astype(BF16)
    b_in1 = pad(params["b_in1"], 1, HP)
    bn0_s = pad(params["bn0_s"], 1, HP)
    bn0_b = pad(params["bn0_b"], 1, HP)
    w_in2 = pad(params["w_in2"], HP, HP).astype(BF16)
    b_in2 = pad(params["b_in2"], 1, HP)
    cw1 = [pad(params["cw1"][l], HP, HP).astype(BF16) for l in range(3)]
    cb1 = [pad(params["cb1"][l], 1, HP) for l in range(3)]
    cw2 = [pad(params["cw2"][l], HP, HP).astype(BF16) for l in range(3)]
    cb2 = [pad(params["cb2"][l], 1, HP) for l in range(3)]
    bns = [pad(params["bns"][l], 1, HP) for l in range(3)]
    bnb = [pad(params["bnb"][l], 1, HP) for l in range(3)]
    wp = [pad(params["wp"][l], HP, HP).astype(BF16) for l in range(4)]
    bp_sum = pad(jnp.sum(params["bp"], axis=0), 1, HP)

    xp = pad(x.astype(F32), NP, CP)

    row = lambda i: (i, 0)
    full = lambda i: (0, 0)

    # ---- stem: h0 = lin1_2(relu(bn(lin1(x)))), tiled over node rows ----------
    h0 = pl.pallas_call(
        _stem_kernel,
        out_shape=jax.ShapeDtypeStruct((NP, HP), BF16),
        grid=(nt,),
        in_specs=[
            pl.BlockSpec((TM, CP), row),
            pl.BlockSpec((CP, HP), full),
            pl.BlockSpec((1, HP), full),
            pl.BlockSpec((1, HP), full),
            pl.BlockSpec((1, HP), full),
            pl.BlockSpec((HP, HP), full),
            pl.BlockSpec((1, HP), full),
        ],
        out_specs=pl.BlockSpec((TM, HP), row),
        compiler_params=pltpu.CompilerParams(
            dimension_semantics=("parallel",), vmem_limit_bytes=_VMEM_LIMIT),
    )(xp, w_in1, b_in1, bn0_s, bn0_b, w_in2, b_in2)

    # ---- GINConv layers: (dst_tile, src_tile) grid, K-reduction in VMEM ------
    def conv_specs(with_prev):
        specs = [
            pl.BlockSpec((TM, TK), lambda i, k: (i, k)),    # A tile (bf16)
            pl.BlockSpec((TK, HP), lambda i, k: (k, 0)),    # h, source rows (bf16)
            pl.BlockSpec((TM, HP), lambda i, k: (i, 0)),    # h, self/dst rows
        ]
        if with_prev:
            specs.append(pl.BlockSpec((TM, HP), lambda i, k: (i, 0)))  # h1 rows
        specs += [
            pl.BlockSpec((HP, HP), lambda i, k: (0, 0)),    # resident weights
            pl.BlockSpec((1, HP), lambda i, k: (0, 0)),
            pl.BlockSpec((HP, HP), lambda i, k: (0, 0)),
            pl.BlockSpec((1, HP), lambda i, k: (0, 0)),
            pl.BlockSpec((1, HP), lambda i, k: (0, 0)),
            pl.BlockSpec((1, HP), lambda i, k: (0, 0)),
        ]
        return specs

    conv_flops = int(2 * NP * NP * HP + 2 * 2 * NP * HP * HP)
    conv_bytes = int(2 * NP * NP                     # A, bf16
                     + 2 * NP * HP * (nt + 2)        # hsrc re-reads + hdst + hout
                     + 2 * 2 * HP * HP + 6 * 4 * HP)
    conv_cost = pl.CostEstimate(flops=conv_flops, transcendentals=0,
                                bytes_accessed=conv_bytes)
    conv3_cost = pl.CostEstimate(flops=conv_flops, transcendentals=0,
                                 bytes_accessed=conv_bytes + int(6 * NP * HP))
    conv_params = pltpu.CompilerParams(
        dimension_semantics=("parallel", "arbitrary"),
        vmem_limit_bytes=_VMEM_LIMIT)

    def conv_layer(h, l):
        return pl.pallas_call(
            _conv_kernel,
            out_shape=jax.ShapeDtypeStruct((NP, HP), BF16),
            grid=(nt, nk),
            in_specs=conv_specs(False),
            out_specs=pl.BlockSpec((TM, HP), lambda i, k: (i, 0)),
            scratch_shapes=[pltpu.VMEM((TM, HP), F32)],
            compiler_params=conv_params,
            cost_estimate=conv_cost,
        )(A, h, h, cw1[l], cb1[l], cw2[l], cb2[l], bns[l], bnb[l])

    h1 = conv_layer(h0, 0)
    h2 = conv_layer(h1, 1)

    # conv3 also emits the fused node-level readout (h1 + h2 + h3).
    h3, node_pool = pl.pallas_call(
        _conv3_kernel,
        out_shape=(jax.ShapeDtypeStruct((NP, HP), BF16),
                   jax.ShapeDtypeStruct((NP, HP), F32)),
        grid=(nt, nk),
        in_specs=conv_specs(True),
        out_specs=(pl.BlockSpec((TM, HP), lambda i, k: (i, 0)),
                   pl.BlockSpec((TM, HP), lambda i, k: (i, 0))),
        scratch_shapes=[pltpu.VMEM((TM, HP), F32)],
        compiler_params=conv_params,
        cost_estimate=conv3_cost,
    )(A, h2, h2, h1, cw1[2], cb1[2], cw2[2], cb2[2], bns[2], bnb[2])

    # ---- graph readout: pool-over-nodes first, then tiny Wp application ------
    gpool = pl.pallas_call(
        _gpool_kernel,
        out_shape=jax.ShapeDtypeStruct((GP, HP), F32),
        grid=(nt,),
        in_specs=[pl.BlockSpec((TM, GP), row)]
                 + [pl.BlockSpec((TM, HP), row)] * 4
                 + [pl.BlockSpec((HP, HP), full)] * 4
                 + [pl.BlockSpec((1, HP), full)],
        out_specs=pl.BlockSpec((GP, HP), full),
        scratch_shapes=[pltpu.VMEM((GP, HP), F32) for _ in range(4)],
        compiler_params=pltpu.CompilerParams(
            dimension_semantics=("arbitrary",), vmem_limit_bytes=_VMEM_LIMIT),
    )(PT, h0, h1, h2, h3, wp[0], wp[1], wp[2], wp[3], bp_sum)

    return node_pool[:N, :H], gpool[:G, :H]


# ------------------------------ params / reference ---------------------------

def init_params(key, in_chnl, hid):
    ks = iter(jax.random.split(key, 32))

    def lin(k, fan_in, fan_out):
        # torch.nn.Linear init; stored as [in, out] (weight.T) so kernels do x@W+b.
        bound = 1.0 / float(fan_in) ** 0.5
        kw, kb = jax.random.split(k)
        W = jax.random.uniform(kw, (fan_in, fan_out), F32, -bound, bound)
        b = jax.random.uniform(kb, (1, fan_out), F32, -bound, bound)
        return W, b

    def bn(k, c):
        kg, kb, km, kv = jax.random.split(k, 4)
        gamma = 1.0 + 0.1 * jax.random.normal(kg, (1, c), F32)
        beta = 0.1 * jax.random.normal(kb, (1, c), F32)
        mean = 0.1 * jax.random.normal(km, (1, c), F32)
        var = jnp.abs(1.0 + 0.1 * jax.random.normal(kv, (1, c), F32))
        scale = gamma / jnp.sqrt(var + 1e-5)
        shift = beta - mean * scale
        return scale, shift

    p = {}
    p["w_in1"], p["b_in1"] = lin(next(ks), in_chnl, hid)
    p["bn0_s"], p["bn0_b"] = bn(next(ks), hid)
    p["w_in2"], p["b_in2"] = lin(next(ks), hid, hid)

    cw1, cb1, cw2, cb2, bns, bnb = [], [], [], [], [], []
    for _ in range(3):
        w1, b1 = lin(next(ks), hid, hid)
        w2, b2 = lin(next(ks), hid, hid)
        s, sh = bn(next(ks), hid)
        cw1.append(w1); cb1.append(b1); cw2.append(w2); cb2.append(b2)
        bns.append(s); bnb.append(sh)
    p["cw1"] = jnp.stack(cw1); p["cb1"] = jnp.stack(cb1)
    p["cw2"] = jnp.stack(cw2); p["cb2"] = jnp.stack(cb2)
    p["bns"] = jnp.stack(bns); p["bnb"] = jnp.stack(bnb)

    wp, bp = [], []
    for _ in range(4):
        w, b = lin(next(ks), hid, hid)
        wp.append(w); bp.append(b)
    p["wp"] = jnp.stack(wp); p["bp"] = jnp.stack(bp)
    return p


def _reference_forward(x, edge_index, batch, params, num_graphs):
    # Pure-JAX f32 reference of the PyTorch module (eval mode).
    N = x.shape[0]
    src, dst = edge_index[0], edge_index[1]
    A = jnp.zeros((N, N), F32).at[dst, src].add(1.0)
    deg = A.sum(axis=1, keepdims=True)
    A = jnp.where(deg > 0, A / jnp.maximum(deg, 1.0), 0.0)
    onehot = (batch[None, :] == jnp.arange(num_graphs)[:, None]).astype(F32)
    P = onehot / jnp.maximum(onehot.sum(axis=1, keepdims=True), 1.0)

    h = x @ params["w_in1"] + params["b_in1"]
    h = jnp.maximum(h * params["bn0_s"] + params["bn0_b"], 0.0)
    h = h @ params["w_in2"] + params["b_in2"]
    hidden = [h]
    node_pool = 0.0
    for l in range(3):
        z = h + A @ h
        z = jnp.maximum(z @ params["cw1"][l] + params["cb1"][l], 0.0)
        z = z @ params["cw2"][l] + params["cb2"][l]
        h = jnp.maximum(z * params["bns"][l] + params["bnb"][l], 0.0)
        node_pool = node_pool + h
        hidden.append(h)
    gpool = 0.0
    for l in range(4):
        gpool = gpool + (P @ hidden[l]) @ params["wp"][l] + params["bp"][l]
    return node_pool, gpool


if __name__ == "__main__":
    key = jax.random.PRNGKey(0)
    k_param, k_x, k_e0, k_e1 = jax.random.split(key, 4)

    in_chnl, hid_chnl = 4, 32
    n_nodes, n_graphs = 16, 2
    edges_per_graph = 20

    x = jax.random.normal(k_x, (n_nodes, in_chnl), F32)
    # Edges kept within each graph's node range.
    e0 = jax.random.randint(k_e0, (2, edges_per_graph), 0, 8)
    e1 = jax.random.randint(k_e1, (2, edges_per_graph), 8, 16)
    edge_index = jnp.concatenate([e0, e1], axis=1).astype(jnp.int32)  # [2, 40]
    batch = jnp.concatenate([jnp.zeros(8, jnp.int32), jnp.ones(8, jnp.int32)])

    params = init_params(k_param, in_chnl, hid_chnl)

    # row_tile=8 exercises multi-tile grids even at this toy node count.
    node_pool, gpool = gin_embedding_forward(
        x, edge_index, batch, params, n_graphs, row_tile=8)
    node_pool = jax.block_until_ready(node_pool)
    gpool = jax.block_until_ready(gpool)

    assert node_pool.shape == (n_nodes, hid_chnl)
    assert gpool.shape == (n_graphs, hid_chnl)
    assert jnp.all(jnp.isfinite(node_pool)) and jnp.all(jnp.isfinite(gpool))

    # Correctness vs. pure-JAX f32 reference (loose tolerance: bf16 MXU inputs
    # plus bf16 storage of A and the hidden states).
    ref_np, ref_gp = _reference_forward(x, edge_index, batch, params, n_graphs)
    tol_np = 1e-2 + 5e-2 * float(jnp.max(jnp.abs(ref_np)))
    tol_gp = 1e-2 + 5e-2 * float(jnp.max(jnp.abs(ref_gp)))
    assert float(jnp.max(jnp.abs(node_pool - ref_np))) < tol_np
    assert float(jnp.max(jnp.abs(gpool - ref_gp))) < tol_gp

    print("KERNEL_OK")
</pallas_src>

<mosaic_0001>
module attributes {stable_mosaic.version = 11 : i64} {
  func.func @_stem_kernel(%arg0: i32, %arg1: memref<8x8xf32, #tpu.memory_space<vmem>>, %arg2: memref<8x128xbf16, #tpu.memory_space<vmem>>, %arg3: memref<1x128xf32, #tpu.memory_space<vmem>>, %arg4: memref<1x128xf32, #tpu.memory_space<vmem>>, %arg5: memref<1x128xf32, #tpu.memory_space<vmem>>, %arg6: memref<128x128xbf16, #tpu.memory_space<vmem>>, %arg7: memref<1x128xf32, #tpu.memory_space<vmem>>, %arg8: memref<8x128xbf16, #tpu.memory_space<vmem>>) attributes {dimension_semantics = [#tpu.dimension_semantics<parallel>], iteration_bounds = array<i64: 16>, scalar_prefetch = 0 : i64, scratch_operands = 0 : i64, tpu.core_type = #tpu.core_type<tc>, window_params = [{transform_indices = @transform_0, window_bounds = array<i64: 8, 8>}, {pipeline_mode = #tpu.pipeline_mode<synchronous>, transform_indices = @transform_1, window_bounds = array<i64: 8, 128>}, {pipeline_mode = #tpu.pipeline_mode<synchronous>, transform_indices = @transform_2, window_bounds = array<i64: 1, 128>}, {pipeline_mode = #tpu.pipeline_mode<synchronous>, transform_indices = @transform_3, window_bounds = array<i64: 1, 128>}, {pipeline_mode = #tpu.pipeline_mode<synchronous>, transform_indices = @transform_4, window_bounds = array<i64: 1, 128>}, {pipeline_mode = #tpu.pipeline_mode<synchronous>, transform_indices = @transform_5, window_bounds = array<i64: 128, 128>}, {pipeline_mode = #tpu.pipeline_mode<synchronous>, transform_indices = @transform_6, window_bounds = array<i64: 1, 128>}, {transform_indices = @transform_7, window_bounds = array<i64: 8, 128>}]} {
    %c0 = arith.constant 0 : index
    %c0_0 = arith.constant 0 : index
    %0 = vector.load %arg1[%c0, %c0_0] : memref<8x8xf32, #tpu.memory_space<vmem>>, vector<8x8xf32>
    %1 = arith.truncf %0 : vector<8x8xf32> to vector<8x8xbf16>
    %c0_1 = arith.constant 0 : index
    %c0_2 = arith.constant 0 : index
    %2 = vector.load %arg2[%c0_1, %c0_2] : memref<8x128xbf16, #tpu.memory_space<vmem>>, vector<8x128xbf16>
    %cst = arith.constant dense<0.000000e+00> : vector<8x128xf32>
    %3 = tpu.matmul %1, %2, %cst {dimension_numbers = #tpu.dot_dimension_numbers<[1], [0], [0], [1], [0, 0, 1, 1], [], []>} : vector<8x8xbf16>, vector<8x128xbf16>, vector<8x128xf32> -> vector<8x128xf32>
    %c0_3 = arith.constant 0 : index
    %c0_4 = arith.constant 0 : index
    %4 = vector.load %arg3[%c0_3, %c0_4] : memref<1x128xf32, #tpu.memory_space<vmem>>, vector<1x128xf32>
    %5 = vector.broadcast %4 : vector<1x128xf32> to vector<8x128xf32>
    %6 = arith.addf %3, %5 : vector<8x128xf32>
    %c0_5 = arith.constant 0 : index
    %c0_6 = arith.constant 0 : index
    %7 = vector.load %arg4[%c0_5, %c0_6] : memref<1x128xf32, #tpu.memory_space<vmem>>, vector<1x128xf32>
    %8 = vector.broadcast %7 : vector<1x128xf32> to vector<8x128xf32>
    %9 = arith.mulf %6, %8 : vector<8x128xf32>
    %c0_7 = arith.constant 0 : index
    %c0_8 = arith.constant 0 : index
    %10 = vector.load %arg5[%c0_7, %c0_8] : memref<1x128xf32, #tpu.memory_space<vmem>>, vector<1x128xf32>
    %11 = vector.broadcast %10 : vector<1x128xf32> to vector<8x128xf32>
    %12 = arith.addf %9, %11 : vector<8x128xf32>
    %cst_9 = arith.constant 0.000000e+00 : f32
    %13 = vector.broadcast %cst_9 : f32 to vector<8x128xf32>
    %14 = arith.maximumf %12, %13 : vector<8x128xf32>
    %15 = arith.truncf %14 : vector<8x128xf32> to vector<8x128xbf16>
    %c0_10 = arith.constant 0 : index
    %c0_11 = arith.constant 0 : index
    %16 = vector.load %arg6[%c0_10, %c0_11] : memref<128x128xbf16, #tpu.memory_space<vmem>>, vector<128x128xbf16>
    %cst_12 = arith.constant dense<0.000000e+00> : vector<8x128xf32>
    %17 = tpu.matmul %15, %16, %cst_12 {dimension_numbers = #tpu.dot_dimension_numbers<[1], [0], [0], [1], [0, 0, 1, 1], [], []>} : vector<8x128xbf16>, vector<128x128xbf16>, vector<8x128xf32> -> vector<8x128xf32>
    %c0_13 = arith.constant 0 : index
    %c0_14 = arith.constant 0 : index
    %18 = vector.load %arg7[%c0_13, %c0_14] : memref<1x128xf32, #tpu.memory_space<vmem>>, vector<1x128xf32>
    %19 = vector.broadcast %18 : vector<1x128xf32> to vector<8x128xf32>
    %20 = arith.addf %17, %19 : vector<8x128xf32>
    %21 = arith.truncf %20 : vector<8x128xf32> to vector<8x128xbf16>
    %c0_15 = arith.constant 0 : index
    %c0_16 = arith.constant 0 : index
    %22 = vector.load %arg8[%c0_15, %c0_16] : memref<8x128xbf16, #tpu.memory_space<vmem>>, vector<8x128xbf16>
    tpu.vector_store %arg8[%c0_15, %c0_16], %21 {strides = array<i32>} : memref<8x128xbf16, #tpu.memory_space<vmem>>, vector<8x128xbf16>,
    return
  }
  func.func @transform_0(%arg0: i32) -> (i32, i32) {
    %c0_i32 = arith.constant 0 : i32
    %c0_i32_0 = arith.constant 0 : i32
    return %arg0, %c0_i32 : i32, i32
  }
  func.func @transform_1(%arg0: i32) -> (i32, i32) {
    %c0_i32 = arith.constant 0 : i32
    %c0_i32_0 = arith.constant 0 : i32
    %c0_i32_1 = arith.constant 0 : i32
    return %c0_i32, %c0_i32_0 : i32, i32
  }
  func.func @transform_2(%arg0: i32) -> (i32, i32) {
    %c0_i32 = arith.constant 0 : i32
    %c0_i32_0 = arith.constant 0 : i32
    %c0_i32_1 = arith.constant 0 : i32
    return %c0_i32, %c0_i32_0 : i32, i32
  }
  func.func @transform_3(%arg0: i32) -> (i32, i32) {
    %c0_i32 = arith.constant 0 : i32
    %c0_i32_0 = arith.constant 0 : i32
    %c0_i32_1 = arith.constant 0 : i32
    return %c0_i32, %c0_i32_0 : i32, i32
  }
  func.func @transform_4(%arg0: i32) -> (i32, i32) {
    %c0_i32 = arith.constant 0 : i32
    %c0_i32_0 = arith.constant 0 : i32
    %c0_i32_1 = arith.constant 0 : i32
    return %c0_i32, %c0_i32_0 : i32, i32
  }
  func.func @transform_5(%arg0: i32) -> (i32, i32) {
    %c0_i32 = arith.constant 0 : i32
    %c0_i32_0 = arith.constant 0 : i32
    %c0_i32_1 = arith.constant 0 : i32
    return %c0_i32, %c0_i32_0 : i32, i32
  }
  func.func @transform_6(%arg0: i32) -> (i32, i32) {
    %c0_i32 = arith.constant 0 : i32
    %c0_i32_0 = arith.constant 0 : i32
    %c0_i32_1 = arith.constant 0 : i32
    return %c0_i32, %c0_i32_0 : i32, i32
  }
  func.func @transform_7(%arg0: i32) -> (i32, i32) {
    %c0_i32 = arith.constant 0 : i32
    %c0_i32_0 = arith.constant 0 : i32
    return %arg0, %c0_i32 : i32, i32
  }
}

</mosaic_0001>

<bundles_post_ra>
// kernel: tpu_custom_call.1
= control target key start
LH: loop header
LB: loop body
LE: loop exit
PB: predicated region body
PF: predicated region fallthrough
CT: control target
= control target key end

     0   :  { %12 = vsyncpa [#allocation3], 0  ;;  %s892_s0 = inlined_call_operand.vmem [shape: f32[128,8], index: 0, kind: input, shape index: {}]   ;;  %s893_s1 = inlined_call_operand.vmem [shape: bf16[8,128], index: 1, kind: input, shape index: {}]   ;;  %s894_s2 = inlined_call_operand.vmem [shape: f32[1,128], index: 2, kind: input, shape index: {}]   ;;  %s895_s3 = inlined_call_operand.vmem [shape: f32[1,128], index: 3, kind: input, shape index: {}]   ;;  %s896_s4 = inlined_call_operand.vmem [shape: f32[1,128], index: 4, kind: input, shape index: {}]   ;;  %s897_s5 = inlined_call_operand.vmem [shape: bf16[128,128], index: 5, kind: input, shape index: {}]   ;;  %s898_s6 = inlined_call_operand.vmem [shape: f32[1,128], index: 6, kind: input, shape index: {}]   ;;  %s899_s7 = inlined_call_operand.hbm [shape: bf16[128,128], index: 7, kind: output, shape index: {}]  }
   0x1   :  { %14 = vsyncpa [#allocation3 + $0x1], 0  ;;  %s753_s24 = smov 0   ;;  %s755_s25 = smov 0  }
   0x2   :  { %s757_s26 = smov 0   ;;  %s759_s27 = smov 0  }
   0x3 LB: > { %s774_s28 = sadd.s32 4294967295, %s708_s27   ;;  %s537_s29 = sadd.s32 4294967294, %s708_s27   ;;  %s708_s27 = sphi %s759_s27, %s905_s27   ;;  %s704_s26 = sphi %s757_s26, %s904_s26   ;;  %s700_s25 = sphi %s755_s25, %s903_s25   ;;  %s696_s24 = sphi %s753_s24, %s902_s24  }
   0x4   : > { %s778_s30 = sadd.s32 1, %s708_s27   ;;  %s179_s8 = sadd.s32 1, %s704_s26 }
   0x5   : > { %s176_s9 = ssub.s32 %s708_s27, %s778_s30  ;;  %p189_p0 = scmp.ne.s32.totalorder %s704_s26, %s700_s25 }
   0x6   : > { %p177_p1 = scmp.eq.s32.totalorder %s176_s9, 0  ;;  %p190_p2 = scmp.eq.s32.totalorder %s774_s28, 15 }
   0x7   : > { %p195_p3 = scmp.ne.s32.totalorder %s700_s25, %s696_s24  ;;  %p196_p4 = scmp.eq.s32.totalorder %s537_s29, 15 }
   0x8   : > { %s789_s10 = scalar_select %p177_p1, %s704_s26, %s179_s8  }
   0x9   : > { %p791_p5 = por %p190_p2, %p189_p0  ;;  %p795_p6 = por %p196_p4, %p195_p3 }
   0xa   : > { %p540_p7 = scmp.ge.s32.totalorder %s708_s27, 1  ;;  %p239_p8 = scmp.lt.s32.totalorder %s708_s27, 17 }
   0xc   : > { %p240_p9 = pnand %p540_p7, %p239_p8 }
   0xd   : > { %v277_v0 = vld [vmem:[%s893_s1] sm:$0xf] (!%p240_p9)  ;;  %vm289_vm0 = vcmask (!%p240_p9), 1043456   ;;  %p270_p10 = scmp.lt.s32.totalorder (!%p240_p9), %s774_s28, 15  ;;  %v710_v1 = vmov (!%p240_p9), 0.0   ;;  %vm711_vm1 = vmmov (!%p240_p9), 0  }
   0xe   : > { %243 = sbr.rel (%p240_p9) target bundleno = 480 (0x1e0), region = 48  ;;  %571 = vmatprep.subr.bf16.mxu0 (!%p240_p9), %v710_v1  ;;  %v291_v2 = vsel (!%p240_p9), %vm289_vm0, %v277_v0, 0  ;;  %573 = vmatprep.mubr.msk.bf16.mxu0 (!%p240_p9), %vm711_vm1, %v710_v1  ;;  %v638_v3 = vld [vmem:[%s897_s5] sm:$0xff] (!%p240_p9)   ;;  %v639_v4 = vld [vmem:[%s897_s5 + $0x8] sm:$0xff] (!%p240_p9)   ;;  %vm285_vm2 = vcmask (!%p240_p9), 64512   ;;  %v640_v6 = vld [vmem:[%s897_s5 + $0x10] sm:$0xff] (!%p240_p9)  }
   0xf   : > { %572 = vmatpush3.bf16.msra.mxu0 (!%p240_p9), %v291_v2  ;;  %577 = vmatprep.subr.bf16.mxu1 (!%p240_p9), %v710_v1  ;;  %v641_v8 = vld [vmem:[%s897_s5 + $0x18] sm:$0xff] (!%p240_p9)   ;;  %v642_v9 = vld [vmem:[%s897_s5 + $0x20] sm:$0xff] (!%p240_p9)   ;;  %v643_v10 = vld [vmem:[%s897_s5 + $0x28] sm:$0xff] (!%p240_p9)   ;;  %s267_s14 = sand.u32 (!%p240_p9), 1, %s700_s25   ;;  %s712_s8 = smov (!%p240_p9), [#allocation2]  }
  0x10   : > { %593 = vmatprep.mubr.msk.bf16.mxu1 (!%p240_p9), %vm711_vm1, %v710_v1  ;;  %578 = vmatpush3.bf16.msra.mxu1 (!%p240_p9), %v638_v3  ;;  %v644_v11 = vld [vmem:[%s897_s5 + $0x30] sm:$0xff] (!%p240_p9)   ;;  %v645_v12 = vld [vmem:[%s897_s5 + $0x38] sm:$0xff] (!%p240_p9)   ;;  %v543_v13 = vld [vmem:[%s894_s2] ss:$0 sm:$0xff] (!%p240_p9)  ;;  %s465_s29 = scalar_lea.sflag (!%p240_p9), [#allocation3], %s267_s14  ;;  %s650_s9 = sshll.u32 (!%p240_p9), %s712_s8, 4  ;;  %s651_s9 = int_to_ptr.vmem [resolvable:$false] %s650_s9 }
  0x11   : > { %579 = vmatprep.subr.bf16.mxu1 (!%p240_p9), %v710_v1  ;;  %v545_v15 = vld [vmem:[%s895_s3] ss:$0 sm:$0xff] (!%p240_p9)  ;;  %s652_s13 = scalar_lea.vmem (!%p240_p9), %s651_s9, 128 }
  0x12   : > { %v546_v18 = vld [vmem:[%s896_s4] ss:$0 sm:$0xff] (!%p240_p9) }
  0x13   : > { %v547_v25 = vld [vmem:[%s898_s6] ss:$0 sm:$0xff] (!%p240_p9) }
  0x14   : > { %580 = vmatpush3.bf16.msra.mxu1 (!%p240_p9), %v639_v4 }
  0x15   : > { %s271_s15 = scalar_select %p270_p10, %s774_s28, 15  ;;  %581 = vmatprep.subr.bf16.mxu1 %v710_v1 }
  0x17   : > { %s542_s18 = sshll.u32 %s271_s15, 3  ;;  %s541_s15 = sshll.u32 %s267_s14, 2 }
  0x18   : > { %s273_s23 = scalar_lea.vmem %s892_s0, %s542_s18  ;;  %582 = vmatpush3.bf16.msra.mxu1 %v640_v6  ;;  %s557_s18 = sshll.u32 %s774_s28, 6 }
  0x19   : > { %v275_v5 = vld [vmem:[%s273_s23] sm:$0xff]  ;;  %583 = vmatprep.subr.bf16.mxu1 %v710_v1  ;;  %s269_s19 = scalar_lea.vmem [#allocation2], %s541_s15  ;;  %s850_s23 = scalar_lea.hbm %s899_s7, %s557_s18 }
  0x1a   : > { %v276_v7 = vpack.c.bf16 %v275_v5, %v275_v5  ;;  %s478_s20 = sshll.u32 %s269_s19, 4  ;;  %s852_s20 = int_to_ptr.vmem [resolvable:$true] %s478_s20 }
  0x1b   : > { %s646_s28 = scalar_lea.vmem %s852_s20, 64  ;;  %p653_p0 = scmp.lt.s32.totalorder %s852_s20, %s651_s9 }
  0x1c   : > { %574 = vmatmul.mubr.msk.bf16.vlgmr.msra.gmra.mrb[0].mxu0 %vm285_vm2, %v276_v7  ;;  %584 = vmatpush3.bf16.msra.mxu1 %v641_v8  ;;  %p647_p11 = scmp.ne.s32.totalorder %s852_s20, %s646_s28  ;;  %p654_p1 = scmp.lt.s32.totalorder %s652_s13, %s646_s28 }
  0x1d   : > { %585 = vmatprep.subr.bf16.mxu1 %v710_v1 }
  0x1e   : > { %p648_p12 = pnand %p647_p11, %p791_p5  ;;  %p655_p2 = por %p654_p1, %p653_p0 }
  0x20   : > { %586 = vmatpush3.bf16.msra.mxu1 %v642_v9  ;;  %p649_p13 = pneg %p648_p12 }
  0x21   : > { %587 = vmatprep.subr.bf16.mxu1 %v710_v1 }
  0x22   : > { %p656_p3 = pnand %p655_p2, %p649_p13 }
  0x24   : > { %588 = vmatpush3.bf16.msra.mxu1 %v643_v10 }
  0x25   : > { %589 = vmatprep.subr.bf16.mxu1 %v710_v1 }
  0x28   : > { %590 = vmatpush3.bf16.msra.mxu1 %v644_v11 }
  0x29   : > { %591 = vmatprep.subr.bf16.mxu1 %v710_v1 }
  0x2c   : > { %592 = vmatpush3.bf16.msra.mxu1 %v645_v12 }
  0xef   : > { %v327_v14 = vpop.f32.mrb[0].mxu0 }
  0xf0   : > { %v328_v16 = vadd.f32 %v543_v13, %v327_v14  ;;  %v575_v17 = vpop.f32.mrb[1].mxu0 }
  0xf1   : > { %v330_v19 = vpop.f32.mrb[2].mxu0 }
  0xf2   : > { %v340_v20 = vmul.f32 %v545_v15, %v328_v16  ;;  %v576_v21 = vpop.f32.mrb[3].mxu0 }
  0xf4   : > { %v348_v22 = vadd.f32 %v546_v18, %v340_v20 }
  0xf6   : > { %v349_v23 = vmax.f32 %v348_v22, 0.0 }
  0xf8   : > { %v350_v24 = vpack.c.bf16 %v349_v23, %v349_v23 }
  0xfa   : > { %594 = vmatmul.mubr.bf16.vlgmr.msra.gmra.mrb[0].mxu1 %v350_v24 }
 0x1cd   : > { %v456_v26 = vpop.f32.mrb[0].mxu1 }
 0x1ce   : > { %v457_v27 = vadd.f32 %v547_v25, %v456_v26  ;;  %v595_v28 = vpop.f32.mrb[1].mxu1 }
 0x1cf   : > { %v459_v29 = vpop.f32.mrb[2].mxu1 }
 0x1d0   : > { %v462_v30 = vpack.c.bf16 %v457_v27, %v457_v27  ;;  %v596_v31 = vpop.f32.mrb[3].mxu1 }
 0x1d2   : > { %463 = vst [vmem:[%s269_s19] sm:$0xf] %v462_v30 }
 0x1d3   : > { %659 = shalt.err (!%p656_p3)
}
 0x1d4   : > { %s660_s14 = scalar_lea.hbm %s850_s23, 64  ;;  %s664_s17 = scalar_lea.hbm %s899_s7, 1024 }
 0x1d5   : > { %p661_p4 = scmp.ne.s32.totalorder %s850_s23, %s660_s14  ;;  %p665_p9 = scmp.lt.u32.totalorder %s850_s23, %s899_s7 }
 0x1d6   : > { %p666_p10 = scmp.lt.u32.totalorder %s664_s17, %s660_s14  ;;  %p668_p12 = scmp.lt.u32.totalorder %s660_s14, %s850_s23 }
 0x1d7   : > { %p662_p7 = pnand %p661_p4, %p791_p5 }
 0x1d8   : > { %p667_p11 = por %p666_p10, %p665_p9 }
 0x1d9   : > { %p663_p8 = pneg %p662_p7 }
 0x1da   : > { %p669_p13 = por %p668_p12, %p667_p11 }
 0x1dc   : > { %p670_p0 = pnand %p669_p13, %p663_p8 }
 0x1de   : > { %673 = shalt.err (!%p670_p0)
}
 0x1df   : > { %597 = dma.vmem_to_hbm [thread:$0]  (%p791_p5), %s852_s20, 64, %s850_s23, %s465_s29  }
 0x1e0 PF: > { %p603_p1 = scmp.ge.s32.totalorder %s708_s27, 2  ;;  %s490_s21 = sand.u32 1, %s696_s24  }
 0x1e1   : > { %s491_s22 = scalar_lea.sflag [#allocation3], %s490_s21 }
 0x1e2   : > { %p600_p2 = pnand %p603_p1, %p795_p6 }
 0x1e4   : > { %691 = dma.done.wait (!%p600_p2), %s491_s22, 64  }
 0x1e5   : > { %693 = vsyncadd (!%p600_p2), %s491_s22, 4294967232  ;;  %p17_p3 = scmp.ge.s32.totalorder %s778_s30, 18   ;;  %s902_s24 = smov %s700_s25 }
 0x1e6   : > { %s903_s25 = smov %s704_s26  ;;  %s904_s26 = smov %s789_s10 }
 0x1e7   : > { %s905_s27 = smov %s778_s30  ;;  %19 = sbr.rel (!%p17_p3) target bundleno = 3 (0x3), region = 83 }
 0x1ee   :  { %496 = vsyncpa [#allocation3], 1 }
 0x1ef   :  { %498 = vsyncpa [#allocation3 + $0x1], 1 }

</bundles_post_ra>
